<compile_context>
chip_gen: v7x
topology: tpu7x:2x2x1
jax: 0.10.0
libtpu: 0.0.40
codegen_flags: <defaults>
</compile_context>

<pallas_src>
import numpy as np
import jax
import jax.numpy as jnp
from jax.experimental import pallas as pl
from jax.experimental.pallas import tpu as pltpu


def _round_up(x, m):
    return ((x + m - 1) // m) * m


# -----------------------------------------------------------------------------
# Kernels
# -----------------------------------------------------------------------------
def _spmm_small_kernel(adj_ref, h_ref, out_ref):
    """Whole problem resident in VMEM: one MXU matmul, no grid, no scratch."""
    out_ref[...] = jnp.dot(
        adj_ref[...], h_ref[...], preferred_element_type=jnp.float32
    ).astype(out_ref.dtype)


def _make_block_kernel(tk, h_resident, use_acc):
    """Block-sparse SpMM kernel factory.

    One nonzero (tm, tk) adjacency block per grid step along axis 1. Blocks are
    ordered row-panel-major, so the accumulator (out_ref itself when the output
    is f32) is zeroed on the first block of each row panel; a separate scratch
    accumulator is only used (and flushed on the last block) for non-f32 out.
    """

    def kernel(rows_ref, cols_ref, dummy_ref, adj_ref, h_ref, out_ref, *scratch):
        acc_ref = scratch[0] if use_acc else out_ref
        b = pl.program_id(1)
        nb = pl.num_programs(1)
        row = rows_ref[b]

        first = jnp.logical_or(b == 0, row != rows_ref[jnp.maximum(b - 1, 0)])

        @pl.when(first)
        def _():
            acc_ref[...] = jnp.zeros_like(acc_ref)

        # Skip the MXU pass entirely for dummy blocks (all-zero row panels).
        @pl.when(dummy_ref[b] == 0)
        def _():
            if h_resident:
                start = pl.multiple_of(cols_ref[b] * tk, tk)
                h_blk = h_ref[pl.ds(start, tk), :]
            else:
                h_blk = h_ref[...]
            acc_ref[...] += jnp.dot(
                adj_ref[...], h_blk, preferred_element_type=jnp.float32
            )

        if use_acc:
            last = jnp.logical_or(
                b == nb - 1, row != rows_ref[jnp.minimum(b + 1, nb - 1)]
            )

            @pl.when(last)
            def _():
                out_ref[...] = acc_ref[...].astype(out_ref.dtype)

    return kernel


# -----------------------------------------------------------------------------
# Host-side block-sparse schedule
# -----------------------------------------------------------------------------
def make_block_schedule(adj_padded, gi, tm, gk, tk):
    """(rows, cols, dummy) list of nonzero (tm, tk) blocks, row-panel-major.

    GPRGNN reuses the same adjacency at every propagation step, so callers
    should compute this once and pass it to `propagation(..., schedule=...)`.
    """
    blk_nnz = np.asarray(jax.device_get(
        jnp.any(adj_padded.reshape(gi, tm, gk, tk) != 0, axis=(1, 3))))
    rows, cols, dummy = [], [], []
    for i in range(gi):
        nz = np.nonzero(blk_nnz[i])[0]
        if nz.size == 0:
            # Keep one flagged block so row panel i's output still gets zeroed.
            rows.append(i); cols.append(0); dummy.append(1)
        else:
            rows.extend([i] * nz.size)
            cols.extend(int(c) for c in nz)
            dummy.extend([0] * nz.size)
    rows = np.asarray(rows, dtype=np.int32)
    cols = np.asarray(cols, dtype=np.int32)
    dummy = np.asarray(dummy, dtype=np.int32)
    assert np.all(np.diff(rows) >= 0), "schedule must be row-panel-major sorted"
    return rows, cols, dummy


# -----------------------------------------------------------------------------
# Wrapper
# -----------------------------------------------------------------------------
def propagation(adj, h, *, tm=512, tk=512, tn_max=2048, use_bf16=True,
                schedule=None,
                small_limit_bytes=2 * 1024 * 1024,
                h_resident_limit_bytes=8 * 1024 * 1024,
                vmem_limit_bytes=48 * 1024 * 1024):
    """adj @ h (GPRGNN Propagation.forward) on TPU via Pallas.

    NOTE: when `schedule` is None the nonzero-block schedule is computed from
    the concrete adjacency with a host sync, so this wrapper is not meant to be
    wrapped in jax.jit as a whole; pass a cached schedule for repeated use.
    """
    N, K = adj.shape
    K2, F = h.shape
    assert K == K2, "adj columns must match number of rows in input"
    out_dtype = h.dtype

    # ---- tile sizes, aligned to the (8/16, 128) vreg tiling -------------------
    sub = 16 if use_bf16 else 8
    tm = min(tm, _round_up(N, sub))
    tk = min(tk, _round_up(K, 128))
    tn = min(tn_max, _round_up(F, 128))

    Np, Kp, Fp = _round_up(N, tm), _round_up(K, tk), _round_up(F, tn)

    # ---- pad only the dims that need it (zero rows/cols keep the product exact)
    adj_p = adj if (Np == N and Kp == K) else jnp.pad(adj, ((0, Np - N), (0, Kp - K)))
    h_p = h if (Kp == K and Fp == F) else jnp.pad(h, ((0, Kp - K), (0, Fp - F)))

    gi, gk, gj = Np // tm, Kp // tk, Fp // tn

    # ---- block-sparse schedule from the original-precision adjacency ----------
    need_schedule = None  # only compute if we take the block-sparse path

    # ---- cast operands (f32 accumulation happens on the MXU) ------------------
    if use_bf16:
        adj_c = adj_p.astype(jnp.bfloat16)
        h_c = h_p.astype(jnp.bfloat16)
    else:
        adj_c, h_c = adj_p, h_p

    total_bytes = (adj_c.size * adj_c.dtype.itemsize
                   + h_c.size * h_c.dtype.itemsize
                   + Np * Fp * np.dtype(out_dtype).itemsize)

    # ---- tiny problems: single block, no grid, no scratch ---------------------
    if total_bytes <= small_limit_bytes:
        out_p = pl.pallas_call(
            _spmm_small_kernel,
            out_shape=jax.ShapeDtypeStruct((Np, Fp), out_dtype),
        )(adj_c, h_c)
        return out_p if (Np == N and Fp == F) else out_p[:N, :F]

    # ---- schedule of nonzero (tm, tk) adjacency blocks ------------------------
    if schedule is None:
        rows_np, cols_np, dummy_np = make_block_schedule(adj_p, gi, tm, gk, tk)
    else:
        rows_np, cols_np, dummy_np = schedule
        rows_np = np.asarray(rows_np, dtype=np.int32)
        cols_np = np.asarray(cols_np, dtype=np.int32)
        dummy_np = np.asarray(dummy_np, dtype=np.int32)
        assert np.all(np.diff(rows_np) >= 0), "schedule must be sorted by row panel"
    rows = jnp.asarray(rows_np)
    cols = jnp.asarray(cols_np)
    dummy = jnp.asarray(dummy_np)
    nb = int(rows_np.shape[0])

    # ---- keep the whole h column panel resident in VMEM when it fits ----------
    h_resident = Kp * tn * h_c.dtype.itemsize <= h_resident_limit_bytes
    if h_resident:
        h_spec = pl.BlockSpec((Kp, tn), lambda j, b, rows, cols, dummy: (0, j))
    else:
        h_spec = pl.BlockSpec((tk, tn), lambda j, b, rows, cols, dummy: (cols[b], j))

    # ---- accumulate directly into out_ref when the output is f32 --------------
    use_acc = np.dtype(out_dtype) != np.dtype(np.float32)
    scratch_shapes = [pltpu.VMEM((tm, tn), jnp.float32)] if use_acc else []

    kernel = _make_block_kernel(tk, h_resident, use_acc)

    out_p = pl.pallas_call(
        kernel,
        out_shape=jax.ShapeDtypeStruct((Np, Fp), out_dtype),
        grid_spec=pltpu.PrefetchScalarGridSpec(
            num_scalar_prefetch=3,
            grid=(gj, nb),
            in_specs=[
                # adjacency block, gathered through the prefetched block lists
                pl.BlockSpec((tm, tk),
                             lambda j, b, rows, cols, dummy: (rows[b], cols[b])),
                # hidden panel (resident column panel or per-block tile)
                h_spec,
            ],
            out_specs=pl.BlockSpec((tm, tn),
                                   lambda j, b, rows, cols, dummy: (rows[b], j)),
            scratch_shapes=scratch_shapes,
        ),
        compiler_params=pltpu.CompilerParams(
            dimension_semantics=("parallel", "arbitrary"),
            vmem_limit_bytes=vmem_limit_bytes),
    )(rows, cols, dummy, adj_c, h_c)
    return out_p if (Np == N and Fp == F) else out_p[:N, :F]


if __name__ == "__main__":
    key = jax.random.PRNGKey(0)
    k1, k2, k3, k4, k5, k6 = jax.random.split(key, 6)

    # ---- Case 1: small graph -> single-block fast path -------------------------
    N1, F1 = 256, 128
    raw1 = jax.random.uniform(k1, (N1, N1), dtype=jnp.float32)
    mask1 = (jax.random.uniform(k2, (N1, N1)) < 0.05).astype(jnp.float32)
    adj1 = raw1 * mask1
    adj1 = adj1 / jnp.maximum(adj1.sum(axis=1, keepdims=True), 1e-6)
    h1 = jax.random.normal(k3, (N1, F1), dtype=jnp.float32)

    ref1 = adj1 @ h1
    out1 = jax.block_until_ready(propagation(adj1, h1))               # bf16 default
    assert out1.shape == (N1, F1)
    assert jnp.allclose(out1, ref1, atol=3e-2, rtol=3e-2)
    out1f = jax.block_until_ready(propagation(adj1, h1, use_bf16=False))
    assert jnp.allclose(out1f, ref1, atol=1e-5, rtol=1e-5)

    # ---- Case 2: larger 2-community graph -> block-sparse skipping path --------
    N2, F2 = 1024, 128
    raw2 = jax.random.uniform(k4, (N2, N2), dtype=jnp.float32)
    mask2 = (jax.random.uniform(k5, (N2, N2)) < 0.05).astype(jnp.float32)
    comm = jnp.arange(N2) // 512
    community = (comm[:, None] == comm[None, :]).astype(jnp.float32)
    adj2 = raw2 * mask2 * community   # off-diagonal 512x512 blocks are all-zero
    adj2 = adj2 / jnp.maximum(adj2.sum(axis=1, keepdims=True), 1e-6)
    h2 = jax.random.normal(k6, (N2, F2), dtype=jnp.float32)

    ref2 = adj2 @ h2
    out2 = jax.block_until_ready(propagation(adj2, h2))                # bf16 default
    assert out2.shape == (N2, F2)
    assert jnp.allclose(out2, ref2, atol=3e-2, rtol=3e-2)
    out2f = jax.block_until_ready(propagation(adj2, h2, use_bf16=False))
    assert jnp.allclose(out2f, ref2, atol=1e-4, rtol=1e-4)

    # ---- Case 3: graph with an all-zero row panel -> dummy-block zero fill -----
    adj3 = adj2 * (jnp.arange(N2)[:, None] < 512).astype(jnp.float32)
    ref3 = adj3 @ h2
    out3 = jax.block_until_ready(propagation(adj3, h2))
    assert jnp.allclose(out3, ref3, atol=3e-2, rtol=3e-2)
    assert jnp.allclose(out3[512:], 0.0)

    print("KERNEL_OK")
</pallas_src>

<mosaic_0001>
module attributes {stable_mosaic.version = 11 : i64} {
  func.func @_spmm_small_kernel(%arg0: memref<256x256xbf16, #tpu.memory_space<vmem>>, %arg1: memref<256x128xbf16, #tpu.memory_space<vmem>>, %arg2: memref<256x128xf32, #tpu.memory_space<vmem>>) attributes {dimension_semantics = [], scalar_prefetch = 0 : i64, scratch_operands = 0 : i64, tpu.core_type = #tpu.core_type<tc>} {
    %c0 = arith.constant 0 : index
    %c0_0 = arith.constant 0 : index
    %0 = vector.load %arg0[%c0, %c0_0] : memref<256x256xbf16, #tpu.memory_space<vmem>>, vector<256x256xbf16>
    %c0_1 = arith.constant 0 : index
    %c0_2 = arith.constant 0 : index
    %1 = vector.load %arg1[%c0_1, %c0_2] : memref<256x128xbf16, #tpu.memory_space<vmem>>, vector<256x128xbf16>
    %cst = arith.constant dense<0.000000e+00> : vector<256x128xf32>
    %2 = tpu.matmul %0, %1, %cst {dimension_numbers = #tpu.dot_dimension_numbers<[1], [0], [0], [1], [0, 0, 1, 1], [], []>} : vector<256x256xbf16>, vector<256x128xbf16>, vector<256x128xf32> -> vector<256x128xf32>
    %c0_3 = arith.constant 0 : index
    %c0_4 = arith.constant 0 : index
    %3 = vector.load %arg2[%c0_3, %c0_4] : memref<256x128xf32, #tpu.memory_space<vmem>>, vector<256x128xf32>
    tpu.vector_store %arg2[%c0_3, %c0_4], %2 {strides = array<i32>} : memref<256x128xf32, #tpu.memory_space<vmem>>, vector<256x128xf32>,
    return
  }
}

</mosaic_0001>

<bundles_post_ra>
// kernel: tpu_custom_call.1
= control target key start
LH: loop header
LB: loop body
LE: loop exit
PB: predicated region body
PF: predicated region fallthrough
CT: control target
= control target key end

     0   :  { %7 = vsyncpa [#allocation3], 0  ;;  %s955_s0 = inlined_call_operand.hbm [shape: bf16[256,256], index: 0, kind: input, shape index: {}]   ;;  %s956_s1 = inlined_call_operand.hbm [shape: bf16[256,128], index: 1, kind: input, shape index: {}]   ;;  %s957_s2 = inlined_call_operand.hbm [shape: f32[256,128], index: 2, kind: output, shape index: {}]  }
   0x1   :  { %8 = vsyncpa [#allocation6], 0 }
   0x2   :  { %9 = vsyncpa [#allocation4], 0  ;;  %s891_s9 = smov [#allocation2]   ;;  %s819_s13 = scalar_lea.hbm %s955_s0, 4096 }
   0x3   :  { %s15_s10 = sshll.u32 %s891_s9, 4  ;;  %p820_p0 = scmp.ne.s32.totalorder %s955_s0, %s819_s13  ;;  %s16_s10 = int_to_ptr.vmem [resolvable:$true] %s15_s10 }
   0x4   :  { %p823_p1 = scmp.lt.u32.totalorder %s819_s13, %s955_s0 }
   0x6   :  { %p825_p2 = pnand %p823_p1, %p820_p0 }
   0x8   :  { %828 = shalt.err (!%p825_p2)
}
   0x9   :  { %s829_s18 = scalar_lea.vmem %s16_s10, 4096  ;;  %p834_p4 = scmp.lt.s32.totalorder %s16_s10, %s16_s10 }
   0xa   :  { %p830_p3 = scmp.ne.s32.totalorder %s16_s10, %s829_s18  ;;  %p835_p5 = scmp.lt.s32.totalorder %s829_s18, %s829_s18 }
   0xc   :  { %p836_p6 = por %p835_p5, %p834_p4 }
   0xe   :  { %p837_p7 = pnand %p836_p6, %p830_p3 }
  0x10   :  { %840 = shalt.err (!%p837_p7)
}
  0x11   :  { %s892_s19 = smov 128   ;;  %s893_s20 = smov 8  }
  0x12   :  { %21 = dma.hbm_to_vmem [thread:$0]  %s955_s0, 4096, %s16_s10, [#allocation3], %s892_s19, %s892_s19, %s893_s20  }
  0x13   :  { %s894_s23 = smov [#allocation5]   ;;  %s841_s27 = scalar_lea.hbm %s956_s1, 2048 }
  0x14   :  { %s27_s24 = sshll.u32 %s894_s23, 4  ;;  %p842_p8 = scmp.ne.s32.totalorder %s956_s1, %s841_s27  ;;  %s28_s24 = int_to_ptr.vmem [resolvable:$true] %s27_s24 }
  0x15   :  { %p845_p9 = scmp.lt.u32.totalorder %s841_s27, %s956_s1 }
  0x17   :  { %p847_p10 = pnand %p845_p9, %p842_p8 }
  0x19   :  { %850 = shalt.err (!%p847_p10)
}
  0x1a   :  { %s851_s4 = scalar_lea.vmem %s28_s24, 2048  ;;  %p856_p12 = scmp.lt.s32.totalorder %s28_s24, %s28_s24 }
  0x1b   :  { %p852_p11 = scmp.ne.s32.totalorder %s28_s24, %s851_s4  ;;  %p857_p13 = scmp.lt.s32.totalorder %s851_s4, %s851_s4 }
  0x1d   :  { %p858_p0 = por %p857_p13, %p856_p12 }
  0x1f   :  { %p859_p1 = pnand %p858_p0, %p852_p11 }
  0x21   :  { %862 = shalt.err (!%p859_p1)
}
  0x22   :  { %s895_s0 = smov 64   ;;  %s896_s5 = smov 4  }
  0x23   :  { %33 = dma.hbm_to_vmem [thread:$0]  %s956_s1, 2048, %s28_s24, [#allocation6], %s895_s0, %s895_s0, %s896_s5  }
  0x24   :  { %885 = dma.done.wait [#allocation3], 4096  }
  0x25   :  { %886 = vsyncadd [#allocation3], 4294963200 }
  0x26   :  { %887 = dma.done.wait [#allocation6], 2048  }
  0x27   :  { %888 = vsyncadd [#allocation6], 4294965248  ;;  %v755_v0 = vld [vmem:[#allocation5 + $0x40] sm:$0xff]   ;;  %v757_v2 = vld [vmem:[#allocation5 + $0x48] sm:$0xff]   ;;  %s897_s1 = smov [#allocation7]  }
  0x28   :  { %v756_v1 = vld [vmem:[#allocation5] sm:$0xff]   ;;  %620 = vmatprep.subr.bf16.mxu0 %v755_v0  ;;  %732 = vmatprep.subr.bf16.mxu1 %v755_v0  ;;  %v758_v3 = vld [vmem:[#allocation5 + $0x8] sm:$0xff]   ;;  %v759_v4 = vld [vmem:[#allocation5 + $0x50] sm:$0xff]   ;;  %s559_s8 = sshll.u32 %s897_s1, 4  ;;  %s560_s8 = int_to_ptr.vmem [resolvable:$true] %s559_s8 }
  0x29   :  { %621 = vmatpush3.bf16.msra.mxu0 %v756_v1  ;;  %740 = vmatpush3.bf16.msra.mxu1 %v756_v1  ;;  %v760_v5 = vld [vmem:[#allocation5 + $0x10] sm:$0xff]   ;;  %v761_v6 = vld [vmem:[#allocation5 + $0x58] sm:$0xff]   ;;  %v763_v8 = vld [vmem:[#allocation5 + $0x60] sm:$0xff]   ;;  %s863_s9 = scalar_lea.vmem %s560_s8, 4096  ;;  %p868_p3 = scmp.lt.s32.totalorder %s560_s8, %s560_s8 }
  0x2a   :  { %622 = vmatprep.subr.bf16.mxu0 %v757_v2  ;;  %733 = vmatprep.subr.bf16.mxu1 %v757_v2  ;;  %v762_v7 = vld [vmem:[#allocation5 + $0x18] sm:$0xff]   ;;  %v764_v9 = vld [vmem:[#allocation5 + $0x20] sm:$0xff]   ;;  %v765_v10 = vld [vmem:[#allocation5 + $0x68] sm:$0xff]   ;;  %p864_p2 = scmp.ne.s32.totalorder %s560_s8, %s863_s9  ;;  %p869_p4 = scmp.lt.s32.totalorder %s863_s9, %s863_s9 }
  0x2b   :  { %v773_v11 = vld [vmem:[#allocation2 + $0x4] ss:$8 sps:$4 sm:$0xff]   ;;  %v767_v14 = vld [vmem:[#allocation5 + $0x70] sm:$0xff]   ;;  %v769_v16 = vld [vmem:[#allocation5 + $0x78] sm:$0xff]  }
  0x2c   :  { %v776_v12 = vld [vmem:[#allocation2 + $0x84] ss:$8 sps:$4 sm:$0xff]   ;;  %393 = vmatprep.mubr.bf16.mxu0 %v773_v11  ;;  %v768_v15 = vld [vmem:[#allocation5 + $0x30] sm:$0xff]   ;;  %v770_v17 = vld [vmem:[#allocation5 + $0x38] sm:$0xff]   ;;  %p870_p5 = por %p869_p4, %p868_p3 }
  0x2d   :  { %623 = vmatpush3.bf16.msra.mxu0 %v758_v3  ;;  %741 = vmatpush3.bf16.msra.mxu1 %v758_v3  ;;  %v766_v13 = vld [vmem:[#allocation5 + $0x28] sm:$0xff]   ;;  %v777_v20 = vld [vmem:[#allocation2 + $0x14] ss:$8 sps:$4 sm:$0xff]   ;;  %v781_v22 = vld [vmem:[#allocation2 + $0x10] ss:$8 sps:$4 sm:$0xff]  }
  0x2e   :  { %624 = vmatprep.subr.bf16.mxu0 %v759_v4  ;;  %734 = vmatprep.subr.bf16.mxu1 %v759_v4  ;;  %v771_v18 = vld [vmem:[#allocation2] ss:$8 sps:$4 sm:$0xff]   ;;  %v779_v21 = vld [vmem:[#allocation2 + $0x94] ss:$8 sps:$4 sm:$0xff]   ;;  %v782_v23 = vld [vmem:[#allocation2 + $0x90] ss:$8 sps:$4 sm:$0xff]   ;;  %p871_p6 = pnand %p870_p5, %p864_p2 }
  0x2f   :  { %457 = vmatprep.mubr.bf16.mxu1 %v776_v12  ;;  %v774_v19 = vld [vmem:[#allocation2 + $0x80] ss:$8 sps:$4 sm:$0xff]   ;;  %v783_v24 = vld [vmem:[#allocation2 + $0x24] ss:$8 sps:$4 sm:$0xff]   ;;  %v789_v28 = vld [vmem:[#allocation2 + $0x34] ss:$8 sps:$4 sm:$0xff]  }
  0x30   :  { %v785_v25 = vld [vmem:[#allocation2 + $0xa4] ss:$8 sps:$4 sm:$0xff]   ;;  %v787_v26 = vld [vmem:[#allocation2 + $0x20] ss:$8 sps:$4 sm:$0xff]   ;;  %v791_v29 = vld [vmem:[#allocation2 + $0xb4] ss:$8 sps:$4 sm:$0xff]  }
  0x31   :  { %625 = vmatpush3.bf16.msra.mxu0 %v760_v5  ;;  %742 = vmatpush3.bf16.msra.mxu1 %v760_v5  ;;  %v788_v27 = vld [vmem:[#allocation2 + $0xa0] ss:$8 sps:$4 sm:$0xff]   ;;  %v793_v30 = vld [vmem:[#allocation2 + $0x30] ss:$8 sps:$4 sm:$0xff]   ;;  %v795_v32 = vld [vmem:[#allocation2 + $0x44] ss:$8 sps:$4 sm:$0xff]  }
  0x32   :  { %626 = vmatprep.subr.bf16.mxu0 %v761_v6  ;;  %735 = vmatprep.subr.bf16.mxu1 %v761_v6  ;;  %v794_v31 = vld [vmem:[#allocation2 + $0xb0] ss:$8 sps:$4 sm:$0xff]   ;;  %v797_v33 = vld [vmem:[#allocation2 + $0xc4] ss:$8 sps:$4 sm:$0xff]   ;;  %v799_v34 = vld [vmem:[#allocation2 + $0x40] ss:$8 sps:$4 sm:$0xff]  }
  0x33   :  { %v800_v35 = vld [vmem:[#allocation2 + $0xc0] ss:$8 sps:$4 sm:$0xff]   ;;  %v801_v36 = vld [vmem:[#allocation2 + $0x54] ss:$8 sps:$4 sm:$0xff]   ;;  %v805_v38 = vld [vmem:[#allocation2 + $0x50] ss:$8 sps:$4 sm:$0xff]  }
  0x34   :  { %v803_v37 = vld [vmem:[#allocation2 + $0xd4] ss:$8 sps:$4 sm:$0xff]   ;;  %v806_v39 = vld [vmem:[#allocation2 + $0xd0] ss:$8 sps:$4 sm:$0xff]   ;;  %v807_v40 = vld [vmem:[#allocation2 + $0x64] ss:$8 sps:$4 sm:$0xff]  }
  0x35   :  { %627 = vmatpush3.bf16.msra.mxu0 %v762_v7  ;;  %743 = vmatpush3.bf16.msra.mxu1 %v762_v7  ;;  %v809_v41 = vld [vmem:[#allocation2 + $0xe4] ss:$8 sps:$4 sm:$0xff]   ;;  %v811_v42 = vld [vmem:[#allocation2 + $0x60] ss:$8 sps:$4 sm:$0xff]   ;;  %v813_v44 = vld [vmem:[#allocation2 + $0x74] ss:$8 sps:$4 sm:$0xff]  }
  0x36   :  { %628 = vmatprep.subr.bf16.mxu0 %v763_v8  ;;  %736 = vmatprep.subr.bf16.mxu1 %v763_v8  ;;  %v812_v43 = vld [vmem:[#allocation2 + $0xe0] ss:$8 sps:$4 sm:$0xff]   ;;  %v815_v45 = vld [vmem:[#allocation2 + $0xf4] ss:$8 sps:$4 sm:$0xff]   ;;  %v817_v46 = vld [vmem:[#allocation2 + $0x70] ss:$8 sps:$4 sm:$0xff]  }
  0x37   :  { %v818_v47 = vld [vmem:[#allocation2 + $0xf0] ss:$8 sps:$4 sm:$0xff]  }
  0x39   :  { %629 = vmatpush3.bf16.msra.mxu0 %v764_v9  ;;  %744 = vmatpush3.bf16.msra.mxu1 %v764_v9 }
  0x3a   :  { %630 = vmatprep.subr.bf16.mxu0 %v765_v10  ;;  %737 = vmatprep.subr.bf16.mxu1 %v765_v10 }
  0x3d   :  { %631 = vmatpush3.bf16.msra.mxu0 %v766_v13  ;;  %745 = vmatpush3.bf16.msra.mxu1 %v766_v13 }
  0x3e   :  { %632 = vmatprep.subr.bf16.mxu0 %v767_v14  ;;  %738 = vmatprep.subr.bf16.mxu1 %v767_v14 }
  0x41   :  { %633 = vmatpush3.bf16.msra.mxu0 %v768_v15  ;;  %746 = vmatpush3.bf16.msra.mxu1 %v768_v15 }
  0x42   :  { %634 = vmatprep.subr.bf16.mxu0 %v769_v16  ;;  %739 = vmatprep.subr.bf16.mxu1 %v769_v16 }
  0x45   :  { %635 = vmatpush3.bf16.msra.mxu0 %v770_v17  ;;  %747 = vmatpush3.bf16.msra.mxu1 %v770_v17 }
  0x48   :  { %394 = vmatmul.mubr.bf16.vlgmr.msra.gmra.mrb[0].mxu0 %v771_v18  ;;  %458 = vmatmul.mubr.bf16.vlgmr.msra.gmra.mrb[0].mxu1 %v774_v19 }
  0x49   :  { %401 = vmatprep.mubr.bf16.mxu0 %v777_v20  ;;  %465 = vmatprep.mubr.bf16.mxu1 %v779_v21 }
  0x50   :  { %402 = vmatmul.mubr.bf16.gmra.mrb[4].mxu0 %v781_v22  ;;  %466 = vmatmul.mubr.bf16.gmra.mrb[4].mxu1 %v782_v23 }
  0x51   :  { %409 = vmatprep.mubr.bf16.mxu0 %v783_v24  ;;  %473 = vmatprep.mubr.bf16.mxu1 %v785_v25 }
  0x58   :  { %410 = vmatmul.mubr.bf16.gmra.mrb[8].mxu0 %v787_v26  ;;  %474 = vmatmul.mubr.bf16.gmra.mrb[8].mxu1 %v788_v27 }
  0x59   :  { %417 = vmatprep.mubr.bf16.mxu0 %v789_v28  ;;  %481 = vmatprep.mubr.bf16.mxu1 %v791_v29 }
  0x60   :  { %418 = vmatmul.mubr.bf16.gmra.mrb[12].mxu0 %v793_v30  ;;  %482 = vmatmul.mubr.bf16.gmra.mrb[12].mxu1 %v794_v31 }
  0x61   :  { %425 = vmatprep.mubr.bf16.mxu0 %v795_v32  ;;  %489 = vmatprep.mubr.bf16.mxu1 %v797_v33 }
  0x68   :  { %426 = vmatmul.mubr.bf16.gmra.mrb[16].mxu0 %v799_v34  ;;  %490 = vmatmul.mubr.bf16.gmra.mrb[16].mxu1 %v800_v35 }
  0x69   :  { %433 = vmatprep.mubr.bf16.mxu0 %v801_v36  ;;  %497 = vmatprep.mubr.bf16.mxu1 %v803_v37 }
  0x70   :  { %434 = vmatmul.mubr.bf16.gmra.mrb[20].mxu0 %v805_v38  ;;  %498 = vmatmul.mubr.bf16.gmra.mrb[20].mxu1 %v806_v39 }
  0x71   :  { %441 = vmatprep.mubr.bf16.mxu0 %v807_v40  ;;  %505 = vmatprep.mubr.bf16.mxu1 %v809_v41 }
  0x78   :  { %442 = vmatmul.mubr.bf16.gmra.mrb[24].mxu0 %v811_v42  ;;  %506 = vmatmul.mubr.bf16.gmra.mrb[24].mxu1 %v812_v43 }
  0x79   :  { %449 = vmatprep.mubr.bf16.mxu0 %v813_v44  ;;  %513 = vmatprep.mubr.bf16.mxu1 %v815_v45 }
  0x80   :  { %450 = vmatmul.mubr.bf16.gmra.mrb[28].mxu0 %v817_v46  ;;  %514 = vmatmul.mubr.bf16.gmra.mrb[28].mxu1 %v818_v47 }
 0x11b   :  { %v636_v48 = vpop.f32.mrb[0].mxu0  ;;  %v684_v49 = vpop.f32.mrb[0].mxu1 }
 0x11c   :  { %v637_v50 = vpop.f32.mrb[1].mxu0  ;;  %v685_v51 = vpop.f32.mrb[1].mxu1 }
 0x11d   :  { %v638_v52 = vadd.f32 %v637_v50, %v636_v48  ;;  %v686_v53 = vadd.f32 %v685_v51, %v684_v49  ;;  %v639_v54 = vpop.f32.mrb[2].mxu0  ;;  %v687_v55 = vpop.f32.mrb[2].mxu1 }
 0x11e   :  { %v640_v56 = vpop.f32.mrb[3].mxu0  ;;  %v688_v57 = vpop.f32.mrb[3].mxu1 }
 0x11f   :  { %522 = vst [vmem:[#allocation7] sm:$0xff] %v638_v52  ;;  %538 = vst [vmem:[#allocation7 + $0x80] sm:$0xff] %v686_v53  ;;  %v641_v58 = vadd.f32 %v640_v56, %v639_v54  ;;  %v689_v59 = vadd.f32 %v688_v57, %v687_v55 }
 0x121   :  { %523 = vst [vmem:[#allocation7 + $0x8] sm:$0xff] %v641_v58  ;;  %539 = vst [vmem:[#allocation7 + $0x88] sm:$0xff] %v689_v59 }
 0x123   :  { %v642_v60 = vpop.f32.mrb[4].mxu0  ;;  %v690_v61 = vpop.f32.mrb[4].mxu1 }
 0x124   :  { %v643_v62 = vpop.f32.mrb[5].mxu0  ;;  %v691_v63 = vpop.f32.mrb[5].mxu1 }
 0x125   :  { %v644_v0 = vadd.f32 %v643_v62, %v642_v60  ;;  %v692_v1 = vadd.f32 %v691_v63, %v690_v61  ;;  %v645_v2 = vpop.f32.mrb[6].mxu0  ;;  %v693_v3 = vpop.f32.mrb[6].mxu1 }
 0x126   :  { %v646_v4 = vpop.f32.mrb[7].mxu0  ;;  %v694_v5 = vpop.f32.mrb[7].mxu1 }
 0x127   :  { %524 = vst [vmem:[#allocation7 + $0x10] sm:$0xff] %v644_v0  ;;  %540 = vst [vmem:[#allocation7 + $0x90] sm:$0xff] %v692_v1  ;;  %v647_v6 = vadd.f32 %v646_v4, %v645_v2  ;;  %v695_v7 = vadd.f32 %v694_v5, %v693_v3 }
 0x129   :  { %525 = vst [vmem:[#allocation7 + $0x18] sm:$0xff] %v647_v6  ;;  %541 = vst [vmem:[#allocation7 + $0x98] sm:$0xff] %v695_v7 }
 0x12b   :  { %v648_v8 = vpop.f32.mrb[8].mxu0  ;;  %v696_v9 = vpop.f32.mrb[8].mxu1 }
 0x12c   :  { %v649_v10 = vpop.f32.mrb[9].mxu0  ;;  %v697_v11 = vpop.f32.mrb[9].mxu1 }
 0x12d   :  { %v650_v12 = vadd.f32 %v649_v10, %v648_v8  ;;  %v698_v13 = vadd.f32 %v697_v11, %v696_v9  ;;  %v651_v14 = vpop.f32.mrb[10].mxu0  ;;  %v699_v15 = vpop.f32.mrb[10].mxu1 }
 0x12e   :  { %v652_v16 = vpop.f32.mrb[11].mxu0  ;;  %v700_v17 = vpop.f32.mrb[11].mxu1 }
 0x12f   :  { %526 = vst [vmem:[#allocation7 + $0x20] sm:$0xff] %v650_v12  ;;  %542 = vst [vmem:[#allocation7 + $0xa0] sm:$0xff] %v698_v13  ;;  %v653_v18 = vadd.f32 %v652_v16, %v651_v14  ;;  %v701_v19 = vadd.f32 %v700_v17, %v699_v15 }
 0x131   :  { %527 = vst [vmem:[#allocation7 + $0x28] sm:$0xff] %v653_v18  ;;  %543 = vst [vmem:[#allocation7 + $0xa8] sm:$0xff] %v701_v19 }
 0x133   :  { %v654_v20 = vpop.f32.mrb[12].mxu0  ;;  %v702_v21 = vpop.f32.mrb[12].mxu1 }
 0x134   :  { %v655_v22 = vpop.f32.mrb[13].mxu0  ;;  %v703_v23 = vpop.f32.mrb[13].mxu1 }
 0x135   :  { %v656_v24 = vadd.f32 %v655_v22, %v654_v20  ;;  %v704_v25 = vadd.f32 %v703_v23, %v702_v21  ;;  %v657_v26 = vpop.f32.mrb[14].mxu0  ;;  %v705_v27 = vpop.f32.mrb[14].mxu1 }
 0x136   :  { %v658_v28 = vpop.f32.mrb[15].mxu0  ;;  %v706_v29 = vpop.f32.mrb[15].mxu1 }
 0x137   :  { %528 = vst [vmem:[#allocation7 + $0x30] sm:$0xff] %v656_v24  ;;  %544 = vst [vmem:[#allocation7 + $0xb0] sm:$0xff] %v704_v25  ;;  %v659_v30 = vadd.f32 %v658_v28, %v657_v26  ;;  %v707_v31 = vadd.f32 %v706_v29, %v705_v27 }
 0x139   :  { %529 = vst [vmem:[#allocation7 + $0x38] sm:$0xff] %v659_v30  ;;  %545 = vst [vmem:[#allocation7 + $0xb8] sm:$0xff] %v707_v31 }
 0x13b   :  { %v660_v32 = vpop.f32.mrb[16].mxu0  ;;  %v708_v33 = vpop.f32.mrb[16].mxu1 }
 0x13c   :  { %v661_v34 = vpop.f32.mrb[17].mxu0  ;;  %v709_v35 = vpop.f32.mrb[17].mxu1 }
 0x13d   :  { %v662_v36 = vadd.f32 %v661_v34, %v660_v32  ;;  %v710_v37 = vadd.f32 %v709_v35, %v708_v33  ;;  %v663_v38 = vpop.f32.mrb[18].mxu0  ;;  %v711_v39 = vpop.f32.mrb[18].mxu1 }
 0x13e   :  { %v664_v40 = vpop.f32.mrb[19].mxu0  ;;  %v712_v41 = vpop.f32.mrb[19].mxu1 }
 0x13f   :  { %530 = vst [vmem:[#allocation7 + $0x40] sm:$0xff] %v662_v36  ;;  %546 = vst [vmem:[#allocation7 + $0xc0] sm:$0xff] %v710_v37  ;;  %v665_v42 = vadd.f32 %v664_v40, %v663_v38  ;;  %v713_v43 = vadd.f32 %v712_v41, %v711_v39 }
 0x141   :  { %531 = vst [vmem:[#allocation7 + $0x48] sm:$0xff] %v665_v42  ;;  %547 = vst [vmem:[#allocation7 + $0xc8] sm:$0xff] %v713_v43 }
 0x143   :  { %v666_v44 = vpop.f32.mrb[20].mxu0  ;;  %v714_v45 = vpop.f32.mrb[20].mxu1 }
 0x144   :  { %v667_v46 = vpop.f32.mrb[21].mxu0  ;;  %v715_v47 = vpop.f32.mrb[21].mxu1 }
 0x145   :  { %v668_v48 = vadd.f32 %v667_v46, %v666_v44  ;;  %v716_v49 = vadd.f32 %v715_v47, %v714_v45  ;;  %v669_v50 = vpop.f32.mrb[22].mxu0  ;;  %v717_v51 = vpop.f32.mrb[22].mxu1 }
 0x146   :  { %v670_v52 = vpop.f32.mrb[23].mxu0  ;;  %v718_v53 = vpop.f32.mrb[23].mxu1 }
 0x147   :  { %532 = vst [vmem:[#allocation7 + $0x50] sm:$0xff] %v668_v48  ;;  %548 = vst [vmem:[#allocation7 + $0xd0] sm:$0xff] %v716_v49  ;;  %v671_v54 = vadd.f32 %v670_v52, %v669_v50  ;;  %v719_v55 = vadd.f32 %v718_v53, %v717_v51 }
 0x149   :  { %533 = vst [vmem:[#allocation7 + $0x58] sm:$0xff] %v671_v54  ;;  %549 = vst [vmem:[#allocation7 + $0xd8] sm:$0xff] %v719_v55 }
 0x14b   :  { %v672_v56 = vpop.f32.mrb[24].mxu0  ;;  %v720_v57 = vpop.f32.mrb[24].mxu1 }
 0x14c   :  { %v673_v58 = vpop.f32.mrb[25].mxu0  ;;  %v721_v59 = vpop.f32.mrb[25].mxu1 }
 0x14d   :  { %v674_v60 = vadd.f32 %v673_v58, %v672_v56  ;;  %v722_v61 = vadd.f32 %v721_v59, %v720_v57  ;;  %v675_v62 = vpop.f32.mrb[26].mxu0  ;;  %v723_v63 = vpop.f32.mrb[26].mxu1 }
 0x14e   :  { %v676_v0 = vpop.f32.mrb[27].mxu0  ;;  %v724_v1 = vpop.f32.mrb[27].mxu1 }
 0x14f   :  { %534 = vst [vmem:[#allocation7 + $0x60] sm:$0xff] %v674_v60  ;;  %550 = vst [vmem:[#allocation7 + $0xe0] sm:$0xff] %v722_v61  ;;  %v677_v2 = vadd.f32 %v676_v0, %v675_v62  ;;  %v725_v3 = vadd.f32 %v724_v1, %v723_v63 }
 0x151   :  { %535 = vst [vmem:[#allocation7 + $0x68] sm:$0xff] %v677_v2  ;;  %551 = vst [vmem:[#allocation7 + $0xe8] sm:$0xff] %v725_v3 }
 0x153   :  { %v678_v4 = vpop.f32.mrb[28].mxu0  ;;  %v726_v5 = vpop.f32.mrb[28].mxu1 }
 0x154   :  { %v679_v6 = vpop.f32.mrb[29].mxu0  ;;  %v727_v7 = vpop.f32.mrb[29].mxu1 }
 0x155   :  { %v680_v8 = vadd.f32 %v679_v6, %v678_v4  ;;  %v728_v9 = vadd.f32 %v727_v7, %v726_v5  ;;  %v681_v10 = vpop.f32.mrb[30].mxu0  ;;  %v729_v11 = vpop.f32.mrb[30].mxu1 }
 0x156   :  { %v682_v12 = vpop.f32.mrb[31].mxu0  ;;  %v730_v13 = vpop.f32.mrb[31].mxu1 }
 0x157   :  { %536 = vst [vmem:[#allocation7 + $0x70] sm:$0xff] %v680_v8  ;;  %552 = vst [vmem:[#allocation7 + $0xf0] sm:$0xff] %v728_v9  ;;  %v683_v14 = vadd.f32 %v682_v12, %v681_v10  ;;  %v731_v15 = vadd.f32 %v730_v13, %v729_v11 }
 0x159   :  { %537 = vst [vmem:[#allocation7 + $0x78] sm:$0xff] %v683_v14  ;;  %553 = vst [vmem:[#allocation7 + $0xf8] sm:$0xff] %v731_v15 }
 0x15a   :  { %874 = shalt.err (!%p871_p6)
}
 0x15b   :  { %s875_s12 = scalar_lea.hbm %s957_s2, 4096 }
 0x15c   :  { %p876_p7 = scmp.ne.s32.totalorder %s957_s2, %s875_s12  ;;  %p879_p8 = scmp.lt.u32.totalorder %s875_s12, %s957_s2 }
 0x15e   :  { %p881_p9 = pnand %p879_p8, %p876_p7 }
 0x160   :  { %884 = shalt.err (!%p881_p9)
}
 0x161   :  { %565 = dma.vmem_to_hbm [thread:$0]  %s560_s8, 4096, %s957_s2, [#allocation4], %s892_s19, %s892_s19, %s893_s20  }
 0x162   :  { %889 = dma.done.wait [#allocation4], 4096  }
 0x163   :  { %890 = vsyncadd [#allocation4], 4294963200 }
 0x164   :  { %569 = vsyncpa [#allocation3], 1 }
 0x165   :  { %570 = vsyncpa [#allocation6], 1 }
 0x166   :  { %571 = vsyncpa [#allocation4], 1 }

</bundles_post_ra>
